<compile_context>
chip_gen: v7x
topology: tpu7x:2x2x1
jax: 0.10.0
libtpu: 0.0.40
codegen_flags: <defaults>
</compile_context>

<pallas_src>
import math
import functools

import jax
import jax.numpy as jnp
from jax.experimental import pallas as pl
from jax.experimental.pallas import tpu as pltpu


# ----------------------------------------------------------------------------
# Buffer construction (plain JAX glue) -- matches sinusoidal_pos_embedding()
# in the PyTorch reference (even d_model, pos_offset=0, no max_allowed cap).
# ----------------------------------------------------------------------------
def sinusoidal_pos_embedding(d_model: int, max_len: int = 5000, pos_offset: int = 0,
                             scale: float = 1.0) -> jnp.ndarray:
    position = (jnp.arange(0, max_len, dtype=jnp.float32) + pos_offset)[:, None]   # (L, 1)
    div_term = jnp.exp(
        jnp.arange(0, d_model, 2, dtype=jnp.float32) * (-math.log(10000.0) / d_model)
    )                                                                               # (D/2,)
    ang = position * div_term                                                       # (L, D/2)
    # interleave sin / cos -> pe[:, 0::2] = sin, pe[:, 1::2] = cos
    pe = jnp.stack([jnp.sin(ang), jnp.cos(ang)], axis=-1).reshape(max_len, d_model)
    return pe * scale


# ----------------------------------------------------------------------------
# Pallas kernel: y = x + pe (broadcast over batch), optional inverted dropout.
#   x_ref   : (TR, L)      lane-dense slab tile, L = k * B * D (multiple of 128
#                          when the widening applies; else the full B*D).
#   pe_ref  : (TR, k * D)  pe tile for the k sequence rows folded into each
#                          slab row (NO batch expansion in HBM).
#   bits_ref: (TR, L)      uint32 random bits (training only).
# ----------------------------------------------------------------------------
def _posenc_kernel(*refs, B: int, D: int, k: int, p: float, training: bool):
    if training:
        x_ref, pe_ref, bits_ref, o_ref = refs
    else:
        x_ref, pe_ref, o_ref = refs
        bits_ref = None

    x = x_ref[...].astype(jnp.float32)          # no-op for f32 inputs
    pe_t = pe_ref[...]                          # (TR, k*D) f32

    if k * B == 1:
        pe_w = pe_t
    else:
        # Widened-row lane layout is [j in 0..k) x [b in 0..B) x [d in 0..D):
        # replicate each D-chunk of the pe tile B times along lanes.  Pure
        # lane-slice copies + concat on the small pe tile; no HBM traffic,
        # no (ts, B*D) pre-expanded pe stream.
        chunks = []
        for j in range(k):
            cj = pe_t[:, j * D:(j + 1) * D]
            chunks.extend([cj] * B)
        pe_w = jnp.concatenate(chunks, axis=1)  # (TR, L)

    y = x + pe_w

    if training and p > 0.0:
        # inverted dropout via raw-bits threshold compare (no f32 uniform temp).
        # RNG stream differs from PyTorch's; semantics match nn.Dropout(train).
        bits = bits_ref[...]                                    # uint32
        threshold = jnp.uint32(min(int(p * 4294967296.0), 4294967295))
        keep = bits >= threshold                                # P(drop) = p
        y = jnp.where(keep, y * (1.0 / (1.0 - p)), 0.0)

    o_ref[...] = y.astype(o_ref.dtype)


# ----------------------------------------------------------------------------
# Per-generation VMEM / tile budget (v7x has only 64 MiB VMEM per TensorCore).
# ----------------------------------------------------------------------------
def _vmem_budget(training: bool):
    cap = None
    try:
        cap = getattr(pltpu.get_tpu_info(), "vmem_capacity_bytes", None)
    except Exception:
        cap = None
    if cap is not None and cap >= 100 * 1024 * 1024:    # v5e / v6e: 128 MiB VMEM
        tile_bytes, vmem_limit = 8 << 20, 96 * 1024 * 1024
    else:                                               # v7x (64 MiB / TC) or unknown
        tile_bytes, vmem_limit = 4 << 20, 48 * 1024 * 1024
    if training:
        tile_bytes //= 2    # dropout-bits stream + mask temps roughly double the working set
    return tile_bytes, vmem_limit


def positional_encoding_forward(x: jnp.ndarray, pe: jnp.ndarray, offset: int = 0,
                                *, p: float = 0.1, training: bool = False,
                                seed: int = 0, block_rows: int | None = None,
                                target_block_bytes: int | None = None) -> jnp.ndarray:
    """x: (S, B, D) (batch_first=False); pe: (max_len, D) precomputed table."""
    S, B, D = x.shape
    out_dtype = jnp.promote_types(x.dtype, pe.dtype)    # PyTorch promotes vs the f32 buffer

    # pe.narrow(0, offset, S) in f32.
    # TODO(synk): fold this offset slice into the pe BlockSpec index_map via a
    # scalar-prefetched offset to drop this (tiny) extra XLA op / retrace per offset.
    pe_slice = jax.lax.dynamic_slice(pe, (offset, 0), (S, D)).astype(jnp.float32)

    # Lane-dense slab: fold batch into lanes; if B*D % 128 != 0 additionally
    # group k consecutive sequence rows per slab row so the lane dim is a
    # multiple of 128 (unmasked vld/vst).  Both reshapes are free contiguous
    # merges; pe stays S*D in HBM.
    W0 = B * D
    if W0 % 128 == 0:
        k = 1
    else:
        k = 128 // math.gcd(W0, 128)
        if k <= 1 or S % k != 0:
            k = 1                        # fallback: masked lane tail, still correct
    R, L = S // k, k * W0
    x2 = x.reshape(R, L)
    pe2 = pe_slice.reshape(R, k * D)

    do_dropout = training and p > 0.0

    # Sequence-slab tiling: multiple of 8 rows, ~tile_bytes of x per block.
    tile_bytes, vmem_limit = _vmem_budget(do_dropout)
    if target_block_bytes is not None:
        tile_bytes = target_block_bytes
    row_bytes = L * x2.dtype.itemsize
    if block_rows is not None:
        ts = block_rows
    elif R <= 8:
        ts = R
    else:
        ts = max(8, (min(R, tile_bytes // max(row_bytes, 1)) // 8) * 8)
        # keep >= 2 grid steps when possible so both v7x TensorCores get work
        half = max(8, ((-(-R // 2)) + 7) // 8 * 8)
        ts = min(ts, half, R)
    grid = (pl.cdiv(R, ts),)

    in_specs = [
        pl.BlockSpec((ts, L), lambda i: (i, 0)),
        pl.BlockSpec((ts, k * D), lambda i: (i, 0)),
    ]
    operands = [x2, pe2]
    if do_dropout:
        # TODO(synk): on real TPU pltpu.prng_random_bits would avoid streaming
        # the mask bits from HBM; kept host-side for portability (interpret
        # mode) and so the mask does not depend on the tiling.
        bits = jax.random.bits(jax.random.PRNGKey(seed), (R, L), dtype=jnp.uint32)
        in_specs.append(pl.BlockSpec((ts, L), lambda i: (i, 0)))
        operands.append(bits)

    flops_per_elem = 3 if do_dropout else 1
    bytes_accessed = (x2.size * x2.dtype.itemsize
                      + x2.size * jnp.dtype(out_dtype).itemsize
                      + pe2.size * 4)
    if do_dropout:
        bytes_accessed += x2.size * 4
    cost = pl.CostEstimate(flops=int(x2.size) * flops_per_elem,
                           transcendentals=0,
                           bytes_accessed=int(bytes_accessed))

    kernel = functools.partial(_posenc_kernel, B=B, D=D, k=k, p=float(p),
                               training=do_dropout)

    out2 = pl.pallas_call(
        kernel,
        out_shape=jax.ShapeDtypeStruct((R, L), out_dtype),
        grid_spec=pltpu.PrefetchScalarGridSpec(
            num_scalar_prefetch=0,
            grid=grid,
            in_specs=in_specs,
            out_specs=pl.BlockSpec((ts, L), lambda i: (i, 0)),
        ),
        compiler_params=pltpu.CompilerParams(
            dimension_semantics=("parallel",),   # independent tiles (v7x 2-TC split)
            vmem_limit_bytes=vmem_limit,
        ),
        cost_estimate=cost,
    )(*operands)

    return out2.reshape(S, B, D)


# ----------------------------------------------------------------------------
# Module-like wrapper holding the buffer (deterministic init, no checkpoint).
# ----------------------------------------------------------------------------
class PositionalEncoding:
    def __init__(self, d_model: int, dropout: float = 0.1, max_len: int = 5000,
                 batch_first: bool = False, scale: float = 1.0, emb_type: str = 'sin'):
        assert not batch_first          # TODO(synk): batch_first=True (B,S,D) layout not implemented
        self.p = dropout
        if emb_type == 'sin':
            self.pe = sinusoidal_pos_embedding(d_model, max_len, 0, scale)   # (max_len, d_model)
        elif emb_type == 'learn':
            # TODO(synk): PyTorch makes this a trainable Parameter; here it is a fixed normal-init table
            self.pe = jax.random.normal(jax.random.PRNGKey(0), (max_len, d_model),
                                        dtype=jnp.float32)
        else:
            raise ValueError(emb_type)

    def __call__(self, x, offset: int = 0, training: bool = False, seed: int = 0,
                 block_rows: int | None = None):
        return positional_encoding_forward(x, self.pe, offset, p=self.p,
                                           training=training, seed=seed,
                                           block_rows=block_rows)


if __name__ == "__main__":
    S, B, D = 64, 2, 32         # B*D = 64 -> lane-widened slab (32, 128)
    max_len = 128
    offset = 2

    key = jax.random.PRNGKey(0)
    x = jax.random.normal(key, (S, B, D), dtype=jnp.float32)

    module = PositionalEncoding(d_model=D, dropout=0.1, max_len=max_len)
    ref = x + module.pe[offset:offset + S][:, None, :]

    # eval-mode forward, forced 2-step grid (exercises the pipeline)
    out = jax.block_until_ready(module(x, offset=offset, training=False, block_rows=16))
    assert out.shape == (S, B, D)
    assert jnp.allclose(out, ref, atol=1e-6), "mismatch vs reference (tiled)"

    # eval-mode forward with auto tile sizing
    out2 = jax.block_until_ready(module(x, offset=offset, training=False))
    assert jnp.allclose(out2, ref, atol=1e-6), "mismatch vs reference (auto tile)"

    # training mode: every element must be either dropped (0) or ref/(1-p)
    out_tr = jax.block_until_ready(module(x, offset=offset, training=True, seed=123,
                                          block_rows=16))
    scaled = ref / (1.0 - module.p)
    ok = jnp.isclose(out_tr, 0.0, atol=1e-6) | jnp.isclose(out_tr, scaled,
                                                           atol=1e-5, rtol=1e-5)
    assert bool(jnp.all(ok)), "dropout output not in {0, ref/(1-p)}"

    print("KERNEL_OK")
</pallas_src>

<mosaic_0001>
module attributes {stable_mosaic.version = 11 : i64} {
  func.func @_posenc_kernel(%arg0: i32, %arg1: memref<16x128xf32, #tpu.memory_space<vmem>>, %arg2: memref<16x64xf32, #tpu.memory_space<vmem>>, %arg3: memref<16x128xf32, #tpu.memory_space<vmem>>) attributes {dimension_semantics = [#tpu.dimension_semantics<parallel>], iteration_bounds = array<i64: 2>, scalar_prefetch = 0 : i64, scratch_operands = 0 : i64, tpu.core_type = #tpu.core_type<tc>, window_params = [{transform_indices = @transform_0, window_bounds = array<i64: 16, 128>}, {transform_indices = @transform_1, window_bounds = array<i64: 16, 64>}, {transform_indices = @transform_2, window_bounds = array<i64: 16, 128>}]} {
    %c0 = arith.constant 0 : index
    %c0_0 = arith.constant 0 : index
    %0 = vector.load %arg1[%c0, %c0_0] : memref<16x128xf32, #tpu.memory_space<vmem>>, vector<16x128xf32>
    %c0_1 = arith.constant 0 : index
    %c0_2 = arith.constant 0 : index
    %1 = vector.load %arg2[%c0_1, %c0_2] : memref<16x64xf32, #tpu.memory_space<vmem>>, vector<16x64xf32>
    %2 = vector.extract_strided_slice %1 {offsets = [0, 0], sizes = [16, 32], strides = [1, 1]} : vector<16x64xf32> to vector<16x32xf32>
    %3 = vector.extract_strided_slice %1 {offsets = [0, 32], sizes = [16, 32], strides = [1, 1]} : vector<16x64xf32> to vector<16x32xf32>
    %4 = tpu.concatenate %2, %2, %3, %3 in 1 : vector<16x32xf32>, vector<16x32xf32>, vector<16x32xf32>, vector<16x32xf32> -> vector<16x128xf32>
    %5 = arith.addf %0, %4 : vector<16x128xf32>
    %c0_3 = arith.constant 0 : index
    %c0_4 = arith.constant 0 : index
    %6 = vector.load %arg3[%c0_3, %c0_4] : memref<16x128xf32, #tpu.memory_space<vmem>>, vector<16x128xf32>
    tpu.vector_store %arg3[%c0_3, %c0_4], %5 {strides = array<i32>} : memref<16x128xf32, #tpu.memory_space<vmem>>, vector<16x128xf32>,
    return
  }
  func.func @transform_0(%arg0: i32) -> (i32, i32) {
    %c0_i32 = arith.constant 0 : i32
    %c0_i32_0 = arith.constant 0 : i32
    return %arg0, %c0_i32 : i32, i32
  }
  func.func @transform_1(%arg0: i32) -> (i32, i32) {
    %c0_i32 = arith.constant 0 : i32
    %c0_i32_0 = arith.constant 0 : i32
    return %arg0, %c0_i32 : i32, i32
  }
  func.func @transform_2(%arg0: i32) -> (i32, i32) {
    %c0_i32 = arith.constant 0 : i32
    %c0_i32_0 = arith.constant 0 : i32
    return %arg0, %c0_i32 : i32, i32
  }
}

</mosaic_0001>

<bundles_post_ra>
// kernel: tpu_custom_call.1
= control target key start
LH: loop header
LB: loop body
LE: loop exit
PB: predicated region body
PF: predicated region fallthrough
CT: control target
= control target key end

     0   :  { %7 = vsyncpa [#allocation3], 0  ;;  %s816_s0 = inlined_call_operand.hbm [shape: f32[32,128], index: 0, kind: input, shape index: {}]   ;;  %s817_s1 = inlined_call_operand.hbm [shape: f32[32,64], index: 1, kind: input, shape index: {}]   ;;  %s818_s2 = inlined_call_operand.hbm [shape: f32[32,128], index: 2, kind: output, shape index: {}]  }
   0x1   :  { %9 = vsyncpa [#allocation3 + $0x1], 0 }
   0x2   :  { %10 = vsyncpa [#allocation6], 0 }
   0x3   :  { %12 = vsyncpa [#allocation6 + $0x1], 0 }
   0x4   :  { %13 = vsyncpa [#allocation4], 0 }
   0x5   :  { %15 = vsyncpa [#allocation4 + $0x1], 0  ;;  %s580_s9 = smov 0   ;;  %s582_s10 = smov 0  }
   0x6   :  { %s584_s11 = smov 0   ;;  %s586_s12 = smov 0  }
   0x7 LB: > { %s601_s13 = sadd.s32 4294967295, %s554_s12   ;;  %s346_s14 = sadd.s32 4294967294, %s554_s12   ;;  %s554_s12 = sphi %s586_s12, %s834_s12   ;;  %s550_s11 = sphi %s584_s11, %s833_s11   ;;  %s546_s10 = sphi %s582_s10, %s832_s10   ;;  %s542_s9 = sphi %s580_s9, %s831_s9  }
   0x8   : > { %s605_s15 = sadd.s32 1, %s554_s12   ;;  %s28_s16 = sadd.s32 1, %s550_s11 }
   0x9   : > { %s25_s17 = ssub.s32 %s554_s12, %s605_s15  ;;  %p35_p0 = scmp.ne.s32.totalorder %s550_s11, %s546_s10 }
   0xa   : > { %p26_p1 = scmp.eq.s32.totalorder %s25_s17, 0  ;;  %p36_p2 = scmp.eq.s32.totalorder %s554_s12, 0 }
   0xb   : > { %p41_p3 = scmp.ne.s32.totalorder %s546_s10, %s542_s9  ;;  %p42_p4 = scmp.eq.s32.totalorder %s601_s13, 0 }
   0xc   : > { %s617_s18 = scalar_select %p26_p1, %s550_s11, %s28_s16  }
   0xd   : > { %p619_p5 = por %p36_p2, %p35_p0  ;;  %p623_p6 = por %p42_p4, %p41_p3 }
   0xe   : > { %p91_p7 = scmp.eq.s32.totalorder %s601_s13, 1  ;;  %p97_p8 = scmp.eq.s32.totalorder %s346_s14, 1 }
   0xf   : > { %s822_s20 = scalar_select %p623_p6, 1, 0 }
  0x10   : > { %p384_p10 = scmp.lt.s32.totalorder %s554_s12, 2  ;;  %p630_p11 = por %p91_p7, %p35_p0 }
  0x11   : > { %p634_p12 = por %p97_p8, %p41_p3  ;;  %s639_s23 = sand.u32 1, %s550_s11  }
  0x12   : > { %s823_s21 = scalar_select %p630_p11, 1, 0 }
  0x13   : > { %s824_s22 = scalar_select %p634_p12, 1, 0 }
  0x14   : > { %s364_s24 = sshll.u32 %s554_s12, 8  ;;  %s349_s25 = sshll.u32 %s639_s23, 4 }
  0x15   : > { %s648_s28 = scalar_lea.hbm %s816_s0, %s364_s24  ;;  %s121_s29 = scalar_lea.vmem [#allocation2], %s349_s25 }
  0x16   : > { %s128_s30 = sshll.u32 %s121_s29, 4  ;;  %p654_p13 = pnand %p384_p10, %p619_p5  ;;  %s658_s30 = int_to_ptr.vmem [resolvable:$true] %s128_s30 }
  0x17   : > { %s118_s4 = scalar_lea.sflag [#allocation3], %s639_s23  ;;  %s424_s5 = scalar_lea.hbm %s648_s28, 256 }
  0x18   : > { %p425_p0 = scmp.ne.s32.totalorder %s648_s28, %s424_s5  ;;  %p426_p1 = pneg %p654_p13 }
  0x19   : > { %s429_s8 = scalar_lea.hbm %s816_s0, 512  ;;  %p430_p4 = scmp.lt.u32.totalorder %s648_s28, %s816_s0 }
  0x1a   : > { %p427_p2 = pnand %p426_p1, %p425_p0  ;;  %p431_p5 = scmp.lt.u32.totalorder %s429_s8, %s424_s5 }
  0x1b   : > { %p433_p8 = scmp.lt.u32.totalorder %s424_s5, %s648_s28 }
  0x1c   : > { %p428_p3 = pneg %p427_p2  ;;  %p432_p7 = por %p431_p5, %p430_p4 }
  0x1e   : > { %p434_p10 = por %p433_p8, %p432_p7 }
  0x20   : > { %p435_p9 = pnand %p434_p10, %p428_p3 }
  0x22   : > { %438 = shalt.err (!%p435_p9)
}
  0x23   : > { %s439_s17 = scalar_lea.vmem %s658_s30, 256  ;;  %s556_s19 = smov [#allocation2]  }
  0x24   : > { %p440_p0 = scmp.ne.s32.totalorder %s658_s30, %s439_s17  ;;  %s444_s26 = sshll.u32 %s556_s19, 4  ;;  %s445_s26 = int_to_ptr.vmem [resolvable:$false] %s444_s26 }
  0x25   : > { %s446_s27 = scalar_lea.vmem %s445_s26, 512  ;;  %p447_p11 = scmp.lt.s32.totalorder %s658_s30, %s445_s26 }
  0x26   : > { %p442_p2 = pnand %p440_p0, %p426_p1  ;;  %p448_p4 = scmp.lt.s32.totalorder %s446_s27, %s439_s17 }
  0x28   : > { %p443_p12 = pneg %p442_p2  ;;  %p449_p5 = por %p448_p4, %p447_p11 }
  0x2a   : > { %p450_p7 = pnand %p449_p5, %p443_p12 }
  0x2c   : > { %453 = shalt.err (!%p450_p7)
}
  0x2d   : > { %s557_s29 = smov 128   ;;  %s558_s5 = smov 8  }
  0x2e   : > { %376 = dma.hbm_to_vmem [thread:$0]  (!%p654_p13), %s648_s28, 256, %s658_s30, %s118_s4, %s557_s29, %s557_s29, %s558_s5  }
  0x2f   : > { %p355_p9 = scmp.ge.s32.totalorder %s554_s12, 1  ;;  %p157_p11 = scmp.lt.s32.totalorder %s554_s12, 3 }
  0x30   : > { %s702_s14 = scalar_lea.hbm %s817_s1, %s364_s24  ;;  %s142_s16 = scalar_lea.vmem [#allocation5], %s349_s25 }
  0x31   : > { %p693_p12 = pnand %p355_p9, %p157_p11  ;;  %s149_s17 = sshll.u32 %s142_s16, 4  ;;  %s706_s17 = int_to_ptr.vmem [resolvable:$true] %s149_s17 }
  0x32   : > { %s139_s28 = scalar_lea.sflag [#allocation6], %s639_s23  ;;  %s454_s30 = scalar_lea.hbm %s702_s14, 256 }
  0x33   : > { %p455_p3 = scmp.ne.s32.totalorder %s702_s14, %s454_s30  ;;  %s459_s24 = scalar_lea.hbm %s817_s1, 512 }
  0x34   : > { %p460_p0 = scmp.lt.u32.totalorder %s702_s14, %s817_s1  ;;  %p461_p2 = scmp.lt.u32.totalorder %s459_s24, %s454_s30 }
  0x35   : > { %p457_p8 = pnand %p455_p3, %p426_p1  ;;  %p463_p5 = scmp.lt.u32.totalorder %s454_s30, %s702_s14 }
  0x36   : > { %p462_p4 = por %p461_p2, %p460_p0 }
  0x37   : > { %p458_p10 = pneg %p457_p8 }
  0x38   : > { %p464_p7 = por %p463_p5, %p462_p4 }
  0x3a   : > { %p465_p9 = pnand %p464_p7, %p458_p10 }
  0x3c   : > { %468 = shalt.err (!%p465_p9)
}
  0x3d   : > { %s469_s25 = scalar_lea.vmem %s706_s17, 256  ;;  %s559_s7 = smov [#allocation5]  }
  0x3e   : > { %p470_p11 = scmp.ne.s32.totalorder %s706_s17, %s469_s25  ;;  %s474_s8 = sshll.u32 %s559_s7, 4  ;;  %s475_s8 = int_to_ptr.vmem [resolvable:$false] %s474_s8 }
  0x3f   : > { %s476_s16 = scalar_lea.vmem %s475_s8, 512  ;;  %p477_p6 = scmp.lt.s32.totalorder %s706_s17, %s475_s8 }
  0x40   : > { %p472_p3 = pnand %p470_p11, %p426_p1  ;;  %p478_p0 = scmp.lt.s32.totalorder %s476_s16, %s469_s25 }
  0x42   : > { %p473_p8 = pneg %p472_p3  ;;  %p479_p2 = por %p478_p0, %p477_p6 }
  0x44   : > { %p480_p4 = pnand %p479_p2, %p473_p8 }
  0x46   : > { %483 = shalt.err (!%p480_p4)
}
  0x47   : > { %379 = dma.hbm_to_vmem [thread:$0]  (!%p654_p13), %s702_s14, 256, %s706_s17, %s139_s28, %s557_s29, %s557_s29, %s558_s5  }
  0x48   : > { %161 = sbr.rel (%p693_p12) target bundleno = 222 (0xde), region = 28  ;;  %s740_s30 = sand.u32 (!%p693_p12), 1, %s546_s10  }
  0x49   : > { %s743_s4 = sshll.u32 (!%p693_p12), %s740_s30, 4  ;;  %s164_s3 = scalar_lea.sflag (!%p693_p12), [#allocation3], %s740_s30 }
  0x4a   : > { %s167_s19 = scalar_lea.vmem (!%p693_p12), [#allocation2], %s743_s4  ;;  %p827_p6 = scmp.ne.s32.totalorder (!%p693_p12), %s822_s20, 0 }
  0x4f   : > { %529 = dma.done.wait (%p827_p6), %s164_s3, 256  }
  0x50   : > { %531 = vsyncadd (%p827_p6), %s164_s3, 4294967040  ;;  %s173_s23 = scalar_lea.sflag [#allocation6], %s740_s30  ;;  %s176_s29 = scalar_lea.vmem [#allocation5], %s743_s4 }
  0x51   : > { %533 = dma.done.wait (%p827_p6), %s173_s23, 256  }
  0x52   : > { %535 = vsyncadd (%p827_p6), %s173_s23, 4294967040  ;;  %v207_v0 = vld [vmem:[%s176_s29] sm:$0xff]  ;;  %s560_s5 = smov 32   ;;  %s561_s6 = smov 64   ;;  %v208_v1 = vld [vmem:[%s176_s29 + $0x8] sm:$0xff]  ;;  %vm223_vm0 = vcmask 261120  }
  0x53   : > { %211 = vrot.lane.b32.xlu0 %v207_v0, %s560_s5  ;;  %217 = vrot.lane.b32.xlu1 %v207_v0, %s561_s6  ;;  %vm226_vm1 = vcmask 523264   ;;  %vm229_vm2 = vcmask 785408   ;;  %v205_v5 = vld [vmem:[%s167_s19] sm:$0xff]  ;;  %s201_s20 = scalar_lea.vmem [#allocation7], %s743_s4  ;;  %s366_s17 = sshll.u32 %s601_s13, 8  ;;  %v206_v12 = vld [vmem:[%s167_s19 + $0x8] sm:$0xff] }
  0x54   : > { %s250_s14 = sshll.u32 %s201_s20, 4  ;;  %s772_s26 = scalar_lea.hbm %s818_s2, %s366_s17  ;;  %s765_s14 = int_to_ptr.vmem [resolvable:$true] %s250_s14 }
  0x55   : > { %s237_s13 = scalar_lea.sflag [#allocation4], %s740_s30  ;;  %s484_s27 = scalar_lea.vmem %s765_s14, 256 }
  0x56   : > { %p485_p13 = scmp.ne.s32.totalorder %s765_s14, %s484_s27  ;;  %p828_p1 = scmp.ne.s32.totalorder %s823_s21, 0 }
  0x57   : > { %213 = vrot.lane.b32.xlu0 %v208_v1, %s560_s5  ;;  %219 = vrot.lane.b32.xlu1 %v208_v1, %s561_s6  ;;  %s562_s25 = smov [#allocation7]  }
  0x58   : > { %p486_p12 = pnand %p485_p13, %p828_p1  ;;  %s488_s7 = sshll.u32 %s562_s25, 4  ;;  %s489_s7 = int_to_ptr.vmem [resolvable:$false] %s488_s7 }
  0x59   : > { %s490_s8 = scalar_lea.vmem %s489_s7, 512  ;;  %p491_p5 = scmp.lt.s32.totalorder %s765_s14, %s489_s7 }
  0x5a   : > { %p487_p10 = pneg %p486_p12  ;;  %p492_p7 = scmp.lt.s32.totalorder %s490_s8, %s484_s27 }
  0x5c   : > { %p493_p9 = por %p492_p7, %p491_p5 }
  0x5e   : > { %p494_p11 = pnand %p493_p9, %p487_p10 }
  0xc5   : > { %v212_v2 = vpop.permute.xlu0 %211  ;;  %v218_v3 = vpop.permute.xlu1 %217 }
  0xc6   : > { %v224_v4 = vsel %vm223_vm0, %v207_v0, %v212_v2 }
  0xc7   : > { %v227_v6 = vsel %vm226_vm1, %v224_v4, %v212_v2 }
  0xc8   : > { %v230_v7 = vsel %vm229_vm2, %v227_v6, %v218_v3 }
  0xc9   : > { %v232_v8 = vadd.f32 %v230_v7, %v205_v5  ;;  %v214_v9 = vpop.permute.xlu0 %213  ;;  %v220_v10 = vpop.permute.xlu1 %219 }
  0xca   : > { %v225_v11 = vsel %vm223_vm0, %v208_v1, %v214_v9 }
  0xcb   : > { %234 = vst [vmem:[%s201_s20] sm:$0xff] %v232_v8  ;;  %v228_v13 = vsel %vm226_vm1, %v225_v11, %v214_v9 }
  0xcc   : > { %v231_v14 = vsel %vm229_vm2, %v228_v13, %v220_v10 }
  0xcd   : > { %v233_v15 = vadd.f32 %v231_v14, %v206_v12 }
  0xcf   : > { %235 = vst [vmem:[%s201_s20 + $0x8] sm:$0xff] %v233_v15 }
  0xd0   : > { %497 = shalt.err (!%p494_p11)
}
  0xd1   : > { %s498_s16 = scalar_lea.hbm %s772_s26, 256  ;;  %s502_s19 = scalar_lea.hbm %s818_s2, 512 }
  0xd2   : > { %p499_p3 = scmp.ne.s32.totalorder %s772_s26, %s498_s16  ;;  %p503_p2 = scmp.lt.u32.totalorder %s772_s26, %s818_s2 }
  0xd3   : > { %p504_p4 = scmp.lt.u32.totalorder %s502_s19, %s498_s16  ;;  %p506_p13 = scmp.lt.u32.totalorder %s498_s16, %s772_s26 }
  0xd4   : > { %p500_p8 = pnand %p499_p3, %p828_p1 }
  0xd5   : > { %p505_p6 = por %p504_p4, %p503_p2 }
  0xd6   : > { %p501_p0 = pneg %p500_p8 }
  0xd7   : > { %p507_p12 = por %p506_p13, %p505_p6 }
  0xd9   : > { %p508_p10 = pnand %p507_p12, %p501_p0 }
  0xdb   : > { %511 = shalt.err (!%p508_p10)
}
  0xdc   : > { %s563_s5 = smov 128   ;;  %s564_s6 = smov 8  }
  0xdd   : > { %371 = dma.vmem_to_hbm [thread:$0]  (%p828_p1), %s765_s14, 256, %s772_s26, %s237_s13, %s563_s5, %s563_s5, %s564_s6  }
  0xde PF: > { %s265_s20 = sand.u32 1, %s542_s9   ;;  %p829_p5 = scmp.ne.s32.totalorder %s824_s22, 0 }
  0xdf   : > { %p830_p7 = scmp.ge.s32.totalorder %s554_s12, 2  ;;  %s266_s17 = scalar_lea.sflag [#allocation4], %s265_s20 }
  0xe1   : > { %p381_p9 = pnand %p830_p7, %p829_p5 }
  0xe3   : > { %537 = dma.done.wait (!%p381_p9), %s266_s17, 256  }
  0xe4   : > { %539 = vsyncadd (!%p381_p9), %s266_s17, 4294967040  ;;  %p18_p11 = scmp.ge.s32.totalorder %s605_s15, 4   ;;  %s831_s9 = smov %s546_s10 }
  0xe5   : > { %s832_s10 = smov %s550_s11  ;;  %s833_s11 = smov %s617_s18 }
  0xe6   : > { %s834_s12 = smov %s605_s15  ;;  %20 = sbr.rel (!%p18_p11) target bundleno = 7 (0x7), region = 86 }
  0xed   :  { %271 = vsyncpa [#allocation3], 1 }
  0xee   :  { %273 = vsyncpa [#allocation3 + $0x1], 1 }
  0xef   :  { %274 = vsyncpa [#allocation6], 1 }
  0xf0   :  { %276 = vsyncpa [#allocation6 + $0x1], 1 }
  0xf1   :  { %277 = vsyncpa [#allocation4], 1 }
  0xf2   :  { %279 = vsyncpa [#allocation4 + $0x1], 1 }

</bundles_post_ra>
